<compile_context>
chip_gen: v7x
topology: tpu7x:2x2x1
jax: 0.10.0
libtpu: 0.0.40
codegen_flags: <defaults>
</compile_context>

<pallas_src>
import functools

import jax
import jax.numpy as jnp
from jax.experimental import pallas as pl
from jax.experimental.pallas import tpu as pltpu


def senn_kernel(x_ref, w1_ref, b1_ref, w2_ref, b2_ref, w3_ref, b3_ref,
                r_ref, s_ref, preds_ref, coeffs_ref, *, compute_dtype):
    """One grid step = one tile of tT time rows; all K lags fused (block-diag).

    x_ref:      (tT, K*D)    time-tile inputs, lags packed along lanes
    w*/b*:      block-diagonal per-lag MLP stacks (constant index_map -> VMEM resident)
    r_ref:      (K*D, K*MD)  constant 0/1 replication matrix (x -> lane layout of c)
    s_ref:      (K*MD, M)    constant 0/1 selection matrix (sums over lag k and dim d)
    preds_ref:  (tT, M)      predictions (unpadded last dim)
    coeffs_ref: (tT, K*MD)   time-major flattened per-lag coefficient matrices
    """
    x = x_ref[...]                                                   # f32
    xm = x.astype(compute_dtype)
    h = jnp.dot(xm, w1_ref[...], preferred_element_type=jnp.float32) + b1_ref[...]
    h = jnp.maximum(h, 0.0)
    h = jnp.dot(h.astype(compute_dtype), w2_ref[...],
                preferred_element_type=jnp.float32) + b2_ref[...]
    h = jnp.maximum(h, 0.0)
    c_all = jnp.dot(h.astype(compute_dtype), w3_ref[...],
                    preferred_element_type=jnp.float32) + b3_ref[...]   # (tT, K*MD) f32

    coeffs_ref[...] = c_all.astype(coeffs_ref.dtype)

    # preds[t, m] = sum_k sum_d C_k[t, m, d] * x_k[t, d]
    # x replicated into c's lane layout via an MXU matmul (exact: R is 0/1, f32),
    # then one elementwise product (VPU) and one selection matmul (MXU).
    x_rep = jnp.dot(x, r_ref[...], preferred_element_type=jnp.float32)  # (tT, K*MD)
    preds_ref[...] = jnp.dot(c_all * x_rep, s_ref[...],
                             preferred_element_type=jnp.float32)


def _block_diag(w):
    """(K, a, b) stack of per-lag matrices -> (K*a, K*b) block-diagonal matrix."""
    K, a, b = w.shape
    eye = jnp.eye(K, dtype=w.dtype)
    return (eye[:, None, :, None] * w[:, :, None, :]).reshape(K * a, K * b)


def _vmem_capacity_bytes():
    try:
        return int(pltpu.get_tpu_info().vmem_capacity_bytes)
    except Exception:
        return 64 * 1024 * 1024          # conservative: v7x per-TensorCore VMEM


def _choose_t_tile(T, cap_rows):
    """Pick a time-tile size: prefer multiple-of-8 divisors of T (no padding, no
    post-kernel slice of the coeffs slab) with >= 2 tiles for v7x megacore."""
    cap_rows = max(8, (min(int(cap_rows), 2048) // 8) * 8)
    if T <= cap_rows:
        lo = max(8, -(-T // 8))                    # at most ~8 tiles
        divs = [c for c in range(8, T // 2 + 1, 8) if T % c == 0 and c >= lo]
        if divs:
            return max(divs), False
        return T, False                            # single full-T block (always legal)
    divs = [c for c in range(8, cap_rows + 1, 8)
            if T % c == 0 and 4 * c >= cap_rows]   # keep tiles reasonably large
    if divs:
        return max(divs), False
    return cap_rows, True                          # padding + post-slice unavoidable


def senn_forward(inputs, params, *, t_tile=None,
                 compute_dtype=jnp.float32, coeffs_dtype=jnp.float32):
    """inputs: (T, K, D) float32, D = num_vars * num_dims.
    params = (w1, b1, w2, b2, w3, b3), stacked per lag:
      w1 (K,D,H), b1 (K,H), w2 (K,H,H), b2 (K,H), w3 (K,H,M*D), b3 (K,M*D).
    Returns (preds (T, M), coeffs (T, K, M, D), None), M = num_vars * out_dims.
    """
    T, K, D = inputs.shape
    w1, b1, w2, b2, w3, b3 = params
    H = w1.shape[-1]
    MD = w3.shape[-1]
    M = MD // D
    KD, KH, KMD = K * D, K * H, K * MD

    cdt = jnp.dtype(compute_dtype)
    codt = jnp.dtype(coeffs_dtype)

    # --- generation-aware time tiling ----------------------------------------
    vmem_cap = _vmem_capacity_bytes()
    wbytes = cdt.itemsize
    # fixed VMEM-resident cost (x2 for pipeline buffering of the constant blocks)
    fixed = 2 * (wbytes * (KD * KH + KH * KH + KH * KMD)
                 + 4 * (2 * KH + KMD)               # biases (f32)
                 + 4 * (KD * KMD + KMD * M))        # R, S (f32)
    # per-time-row cost: streamed blocks are double-buffered + in-kernel temps
    row_bytes = (2 * 4 * KD                         # x block
                 + 2 * codt.itemsize * KMD          # coeffs block
                 + 2 * 4 * M                        # preds block
                 + 4 * (2 * KH + 3 * KMD))          # h, c_all, x_rep / cx temps
    budget = max(vmem_cap * 2 // 5 - fixed, 512 * 1024)
    cap_rows = budget // max(row_bytes, 1)

    if t_tile is None:
        t_tile, _ = _choose_t_tile(T, cap_rows)
    else:
        t_tile = max(8, (int(t_tile) // 8) * 8)
    T_pad = -(-T // t_tile) * t_tile

    # --- operand prep ---------------------------------------------------------
    x = inputs.reshape(T, KD).astype(jnp.float32)        # lags packed along lanes
    if T_pad != T:
        # Padded rows produce bias-derived coeffs but zero preds (x_rep==0 there);
        # the trailing slice below keeps the public outputs exact.
        x = jnp.pad(x, ((0, T_pad - T), (0, 0)))

    w1_bd = _block_diag(w1).astype(cdt)
    w2_bd = _block_diag(w2).astype(cdt)
    w3_bd = _block_diag(w3).astype(cdt)
    b1_r = b1.reshape(1, KH).astype(jnp.float32)
    b2_r = b2.reshape(1, KH).astype(jnp.float32)
    b3_r = b3.reshape(1, KMD).astype(jnp.float32)

    # R replicates x into c's lane layout; S sums over (k, d) onto m.  Both 0/1 f32.
    rows = jnp.arange(KD)
    cols = jnp.arange(KMD)
    rep = ((rows[:, None] // D == cols[None, :] // MD)
           & (rows[:, None] % D == cols[None, :] % D)).astype(jnp.float32)
    sel = (((cols % MD) // D)[:, None] == jnp.arange(M)[None, :]).astype(jnp.float32)

    kern = functools.partial(senn_kernel, compute_dtype=cdt)
    const = lambda t: (0, 0)

    preds_out, coeffs_flat = pl.pallas_call(
        kern,
        out_shape=(
            jax.ShapeDtypeStruct((T_pad, M), jnp.float32),
            jax.ShapeDtypeStruct((T_pad, KMD), codt),
        ),
        grid_spec=pltpu.PrefetchScalarGridSpec(
            num_scalar_prefetch=0,
            grid=(T_pad // t_tile,),
            in_specs=[
                pl.BlockSpec((t_tile, KD), lambda t: (t, 0)),   # x (streamed per tile)
                pl.BlockSpec((KD, KH), const),                  # W1 block-diag (resident)
                pl.BlockSpec((1, KH), const),                   # b1
                pl.BlockSpec((KH, KH), const),                  # W2 block-diag
                pl.BlockSpec((1, KH), const),                   # b2
                pl.BlockSpec((KH, KMD), const),                 # W3 block-diag
                pl.BlockSpec((1, KMD), const),                  # b3
                pl.BlockSpec((KD, KMD), const),                 # R (replication)
                pl.BlockSpec((KMD, M), const),                  # S (selection)
            ],
            out_specs=(
                pl.BlockSpec((t_tile, M), lambda t: (t, 0)),    # preds (unpadded lanes)
                pl.BlockSpec((t_tile, KMD), lambda t: (t, 0)),  # coeffs (time-major)
            ),
        ),
        compiler_params=pltpu.CompilerParams(
            dimension_semantics=("parallel",),   # independent T tiles -> v7x megacore
            vmem_limit_bytes=int(vmem_cap) * 3 // 4,
        ),
    )(x, w1_bd, b1_r, w2_bd, b2_r, w3_bd, b3_r, rep, sel)

    if T_pad != T:
        preds_out = preds_out[:T]
        coeffs_flat = coeffs_flat[:T]
    coeffs = coeffs_flat.reshape(T, K, M, D)     # time-major slab -> free reshape
    return preds_out, coeffs, None


def senn_forward_ref(inputs, params):
    """Pure-JAX f32 reference of the same forward path."""
    T, K, D = inputs.shape
    w1, b1, w2, b2, w3, b3 = params
    MD = w3.shape[-1]
    M = MD // D
    preds = jnp.zeros((T, M), jnp.float32)
    coeff_list = []
    for k in range(K):
        x = inputs[:, k, :]
        h = jnp.maximum(x @ w1[k] + b1[k], 0.0)
        h = jnp.maximum(h @ w2[k] + b2[k], 0.0)
        c = (h @ w3[k] + b3[k]).reshape(T, M, D)
        preds = preds + jnp.sum(c * x[:, None, :], axis=-1)
        coeff_list.append(c[:, None])
    return preds, jnp.concatenate(coeff_list, axis=1), None


def _make_params(key, K, d_in, hidden, d_out, scale=0.1):
    ks = jax.random.split(key, 6)
    w1 = scale * jax.random.normal(ks[0], (K, d_in, hidden), jnp.float32)
    b1 = scale * jax.random.normal(ks[1], (K, hidden), jnp.float32)
    w2 = scale * jax.random.normal(ks[2], (K, hidden, hidden), jnp.float32)
    b2 = scale * jax.random.normal(ks[3], (K, hidden), jnp.float32)
    w3 = scale * jax.random.normal(ks[4], (K, hidden, d_out), jnp.float32)
    b3 = scale * jax.random.normal(ks[5], (K, d_out), jnp.float32)
    return (w1, b1, w2, b2, w3, b3)


if __name__ == "__main__":
    key = jax.random.PRNGKey(0)
    k_p1, k_x1, k_p2, k_x2, k_x3 = jax.random.split(key, 5)

    # --- Config 1: the module's toy configuration -----------------------------
    num_vars, num_dims, out_dims, order, hidden, T = 4, 2, 2, 2, 32, 8
    D_in = num_vars * num_dims                            # 8
    D_out = num_vars * num_dims * num_vars * out_dims     # 64
    params = _make_params(k_p1, order, D_in, hidden, D_out)
    inputs = jax.random.normal(k_x1, (T, order, D_in), jnp.float32)

    preds, coeffs, coeffs_fp = jax.block_until_ready(senn_forward(inputs, params))
    preds_r, coeffs_r, _ = senn_forward_ref(inputs, params)

    assert preds.shape == (T, num_vars * out_dims), preds.shape
    assert coeffs.shape == (T, order, num_vars * out_dims, num_vars * num_dims), coeffs.shape
    assert coeffs_fp is None
    assert jnp.allclose(preds, preds_r, atol=1e-4, rtol=1e-4)
    assert jnp.allclose(coeffs, coeffs_r, atol=1e-4, rtol=1e-4)

    # --- bf16 MXU operands + bf16 coeffs output (f32 accumulation) ------------
    preds_b, coeffs_b, _ = jax.block_until_ready(
        senn_forward(inputs, params, compute_dtype=jnp.bfloat16,
                     coeffs_dtype=jnp.bfloat16))
    assert jnp.allclose(preds_b, preds_r, atol=5e-2, rtol=5e-2)
    assert jnp.allclose(coeffs_b.astype(jnp.float32), coeffs_r, atol=5e-2, rtol=5e-2)

    # --- Config 2: K=3, explicit t_tile with ragged T (pad + slice path) ------
    T2, order2 = 50, 3
    params2 = _make_params(k_p2, order2, D_in, hidden, D_out)
    inputs2 = jax.random.normal(k_x2, (T2, order2, D_in), jnp.float32)
    preds2, coeffs2, _ = jax.block_until_ready(
        senn_forward(inputs2, params2, t_tile=16))
    preds2_r, coeffs2_r, _ = senn_forward_ref(inputs2, params2)
    assert preds2.shape == (T2, num_vars * out_dims)
    assert coeffs2.shape == (T2, order2, num_vars * out_dims, num_vars * num_dims)
    assert jnp.allclose(preds2, preds2_r, atol=1e-4, rtol=1e-4)
    assert jnp.allclose(coeffs2, coeffs2_r, atol=1e-4, rtol=1e-4)

    # --- Config 3: auto tiling picks a multi-tile, no-padding grid ------------
    T3 = 64
    inputs3 = jax.random.normal(k_x3, (T3, order2, D_in), jnp.float32)
    preds3, coeffs3, _ = jax.block_until_ready(senn_forward(inputs3, params2))
    preds3_r, coeffs3_r, _ = senn_forward_ref(inputs3, params2)
    assert jnp.allclose(preds3, preds3_r, atol=1e-4, rtol=1e-4)
    assert jnp.allclose(coeffs3, coeffs3_r, atol=1e-4, rtol=1e-4)

    print("KERNEL_OK")
</pallas_src>

<mosaic_0001>
module attributes {stable_mosaic.version = 11 : i64} {
  func.func @senn_kernel(%arg0: i32, %arg1: memref<8x16xf32, #tpu.memory_space<vmem>>, %arg2: memref<16x64xf32, #tpu.memory_space<vmem>>, %arg3: memref<1x64xf32, #tpu.memory_space<vmem>>, %arg4: memref<64x64xf32, #tpu.memory_space<vmem>>, %arg5: memref<1x64xf32, #tpu.memory_space<vmem>>, %arg6: memref<64x128xf32, #tpu.memory_space<vmem>>, %arg7: memref<1x128xf32, #tpu.memory_space<vmem>>, %arg8: memref<16x128xf32, #tpu.memory_space<vmem>>, %arg9: memref<128x8xf32, #tpu.memory_space<vmem>>, %arg10: memref<8x8xf32, #tpu.memory_space<vmem>>, %arg11: memref<8x128xf32, #tpu.memory_space<vmem>>) attributes {dimension_semantics = [#tpu.dimension_semantics<parallel>], iteration_bounds = array<i64: 1>, scalar_prefetch = 0 : i64, scratch_operands = 0 : i64, tpu.core_type = #tpu.core_type<tc>, window_params = [{transform_indices = @transform_0, window_bounds = array<i64: 8, 16>}, {pipeline_mode = #tpu.pipeline_mode<synchronous>, transform_indices = @transform_1, window_bounds = array<i64: 16, 64>}, {pipeline_mode = #tpu.pipeline_mode<synchronous>, transform_indices = @transform_2, window_bounds = array<i64: 1, 64>}, {pipeline_mode = #tpu.pipeline_mode<synchronous>, transform_indices = @transform_3, window_bounds = array<i64: 64, 64>}, {pipeline_mode = #tpu.pipeline_mode<synchronous>, transform_indices = @transform_4, window_bounds = array<i64: 1, 64>}, {pipeline_mode = #tpu.pipeline_mode<synchronous>, transform_indices = @transform_5, window_bounds = array<i64: 64, 128>}, {pipeline_mode = #tpu.pipeline_mode<synchronous>, transform_indices = @transform_6, window_bounds = array<i64: 1, 128>}, {pipeline_mode = #tpu.pipeline_mode<synchronous>, transform_indices = @transform_7, window_bounds = array<i64: 16, 128>}, {pipeline_mode = #tpu.pipeline_mode<synchronous>, transform_indices = @transform_8, window_bounds = array<i64: 128, 8>}, {transform_indices = @transform_9, window_bounds = array<i64: 8, 8>}, {transform_indices = @transform_10, window_bounds = array<i64: 8, 128>}]} {
    %c0 = arith.constant 0 : index
    %c0_0 = arith.constant 0 : index
    %0 = vector.load %arg1[%c0, %c0_0] : memref<8x16xf32, #tpu.memory_space<vmem>>, vector<8x16xf32>
    %c0_1 = arith.constant 0 : index
    %c0_2 = arith.constant 0 : index
    %1 = vector.load %arg2[%c0_1, %c0_2] : memref<16x64xf32, #tpu.memory_space<vmem>>, vector<16x64xf32>
    %cst = arith.constant dense<0.000000e+00> : vector<8x64xf32>
    %2 = tpu.matmul %0, %1, %cst {dimension_numbers = #tpu.dot_dimension_numbers<[1], [0], [0], [1], [0, 0, 1, 1], [], []>} : vector<8x16xf32>, vector<16x64xf32>, vector<8x64xf32> -> vector<8x64xf32>
    %c0_3 = arith.constant 0 : index
    %c0_4 = arith.constant 0 : index
    %3 = vector.load %arg3[%c0_3, %c0_4] : memref<1x64xf32, #tpu.memory_space<vmem>>, vector<1x64xf32>
    %4 = vector.broadcast %3 : vector<1x64xf32> to vector<8x64xf32>
    %5 = arith.addf %2, %4 : vector<8x64xf32>
    %cst_5 = arith.constant 0.000000e+00 : f32
    %6 = vector.broadcast %cst_5 : f32 to vector<8x64xf32>
    %7 = arith.maximumf %5, %6 : vector<8x64xf32>
    %c0_6 = arith.constant 0 : index
    %c0_7 = arith.constant 0 : index
    %8 = vector.load %arg4[%c0_6, %c0_7] : memref<64x64xf32, #tpu.memory_space<vmem>>, vector<64x64xf32>
    %cst_8 = arith.constant dense<0.000000e+00> : vector<8x64xf32>
    %9 = tpu.matmul %7, %8, %cst_8 {dimension_numbers = #tpu.dot_dimension_numbers<[1], [0], [0], [1], [0, 0, 1, 1], [], []>} : vector<8x64xf32>, vector<64x64xf32>, vector<8x64xf32> -> vector<8x64xf32>
    %c0_9 = arith.constant 0 : index
    %c0_10 = arith.constant 0 : index
    %10 = vector.load %arg5[%c0_9, %c0_10] : memref<1x64xf32, #tpu.memory_space<vmem>>, vector<1x64xf32>
    %11 = vector.broadcast %10 : vector<1x64xf32> to vector<8x64xf32>
    %12 = arith.addf %9, %11 : vector<8x64xf32>
    %cst_11 = arith.constant 0.000000e+00 : f32
    %13 = vector.broadcast %cst_11 : f32 to vector<8x64xf32>
    %14 = arith.maximumf %12, %13 : vector<8x64xf32>
    %c0_12 = arith.constant 0 : index
    %c0_13 = arith.constant 0 : index
    %15 = vector.load %arg6[%c0_12, %c0_13] : memref<64x128xf32, #tpu.memory_space<vmem>>, vector<64x128xf32>
    %cst_14 = arith.constant dense<0.000000e+00> : vector<8x128xf32>
    %16 = tpu.matmul %14, %15, %cst_14 {dimension_numbers = #tpu.dot_dimension_numbers<[1], [0], [0], [1], [0, 0, 1, 1], [], []>} : vector<8x64xf32>, vector<64x128xf32>, vector<8x128xf32> -> vector<8x128xf32>
    %c0_15 = arith.constant 0 : index
    %c0_16 = arith.constant 0 : index
    %17 = vector.load %arg7[%c0_15, %c0_16] : memref<1x128xf32, #tpu.memory_space<vmem>>, vector<1x128xf32>
    %18 = vector.broadcast %17 : vector<1x128xf32> to vector<8x128xf32>
    %19 = arith.addf %16, %18 : vector<8x128xf32>
    %c0_17 = arith.constant 0 : index
    %c0_18 = arith.constant 0 : index
    %20 = vector.load %arg11[%c0_17, %c0_18] : memref<8x128xf32, #tpu.memory_space<vmem>>, vector<8x128xf32>
    tpu.vector_store %arg11[%c0_17, %c0_18], %19 {strides = array<i32>} : memref<8x128xf32, #tpu.memory_space<vmem>>, vector<8x128xf32>,
    %c0_19 = arith.constant 0 : index
    %c0_20 = arith.constant 0 : index
    %21 = vector.load %arg8[%c0_19, %c0_20] : memref<16x128xf32, #tpu.memory_space<vmem>>, vector<16x128xf32>
    %cst_21 = arith.constant dense<0.000000e+00> : vector<8x128xf32>
    %22 = tpu.matmul %0, %21, %cst_21 {dimension_numbers = #tpu.dot_dimension_numbers<[1], [0], [0], [1], [0, 0, 1, 1], [], []>} : vector<8x16xf32>, vector<16x128xf32>, vector<8x128xf32> -> vector<8x128xf32>
    %23 = arith.mulf %19, %22 : vector<8x128xf32>
    %c0_22 = arith.constant 0 : index
    %c0_23 = arith.constant 0 : index
    %24 = vector.load %arg9[%c0_22, %c0_23] : memref<128x8xf32, #tpu.memory_space<vmem>>, vector<128x8xf32>
    %cst_24 = arith.constant dense<0.000000e+00> : vector<8x8xf32>
    %25 = tpu.matmul %23, %24, %cst_24 {dimension_numbers = #tpu.dot_dimension_numbers<[1], [0], [0], [1], [0, 0, 1, 1], [], []>} : vector<8x128xf32>, vector<128x8xf32>, vector<8x8xf32> -> vector<8x8xf32>
    %c0_25 = arith.constant 0 : index
    %c0_26 = arith.constant 0 : index
    %26 = vector.load %arg10[%c0_25, %c0_26] : memref<8x8xf32, #tpu.memory_space<vmem>>, vector<8x8xf32>
    tpu.vector_store %arg10[%c0_25, %c0_26], %25 {strides = array<i32>} : memref<8x8xf32, #tpu.memory_space<vmem>>, vector<8x8xf32>,
    return
  }
  func.func @transform_0(%arg0: i32) -> (i32, i32) {
    %c0_i32 = arith.constant 0 : i32
    %c0_i32_0 = arith.constant 0 : i32
    return %arg0, %c0_i32 : i32, i32
  }
  func.func @transform_1(%arg0: i32) -> (i32, i32) {
    %c0_i32 = arith.constant 0 : i32
    %c0_i32_0 = arith.constant 0 : i32
    %c0_i32_1 = arith.constant 0 : i32
    return %c0_i32, %c0_i32_0 : i32, i32
  }
  func.func @transform_2(%arg0: i32) -> (i32, i32) {
    %c0_i32 = arith.constant 0 : i32
    %c0_i32_0 = arith.constant 0 : i32
    %c0_i32_1 = arith.constant 0 : i32
    return %c0_i32, %c0_i32_0 : i32, i32
  }
  func.func @transform_3(%arg0: i32) -> (i32, i32) {
    %c0_i32 = arith.constant 0 : i32
    %c0_i32_0 = arith.constant 0 : i32
    %c0_i32_1 = arith.constant 0 : i32
    return %c0_i32, %c0_i32_0 : i32, i32
  }
  func.func @transform_4(%arg0: i32) -> (i32, i32) {
    %c0_i32 = arith.constant 0 : i32
    %c0_i32_0 = arith.constant 0 : i32
    %c0_i32_1 = arith.constant 0 : i32
    return %c0_i32, %c0_i32_0 : i32, i32
  }
  func.func @transform_5(%arg0: i32) -> (i32, i32) {
    %c0_i32 = arith.constant 0 : i32
    %c0_i32_0 = arith.constant 0 : i32
    %c0_i32_1 = arith.constant 0 : i32
    return %c0_i32, %c0_i32_0 : i32, i32
  }
  func.func @transform_6(%arg0: i32) -> (i32, i32) {
    %c0_i32 = arith.constant 0 : i32
    %c0_i32_0 = arith.constant 0 : i32
    %c0_i32_1 = arith.constant 0 : i32
    return %c0_i32, %c0_i32_0 : i32, i32
  }
  func.func @transform_7(%arg0: i32) -> (i32, i32) {
    %c0_i32 = arith.constant 0 : i32
    %c0_i32_0 = arith.constant 0 : i32
    %c0_i32_1 = arith.constant 0 : i32
    return %c0_i32, %c0_i32_0 : i32, i32
  }
  func.func @transform_8(%arg0: i32) -> (i32, i32) {
    %c0_i32 = arith.constant 0 : i32
    %c0_i32_0 = arith.constant 0 : i32
    %c0_i32_1 = arith.constant 0 : i32
    return %c0_i32, %c0_i32_0 : i32, i32
  }
  func.func @transform_9(%arg0: i32) -> (i32, i32) {
    %c0_i32 = arith.constant 0 : i32
    %c0_i32_0 = arith.constant 0 : i32
    return %arg0, %c0_i32 : i32, i32
  }
  func.func @transform_10(%arg0: i32) -> (i32, i32) {
    %c0_i32 = arith.constant 0 : i32
    %c0_i32_0 = arith.constant 0 : i32
    return %arg0, %c0_i32 : i32, i32
  }
}

</mosaic_0001>

<bundles_post_ra>
// kernel: tpu_custom_call.1
= control target key start
LH: loop header
LB: loop body
LE: loop exit
PB: predicated region body
PF: predicated region fallthrough
CT: control target
= control target key end

     0   :  { %16 = vsyncpa [#allocation3], 0  ;;  %s1077_s0 = inlined_call_operand.hbm [shape: f32[8,16], index: 0, kind: input, shape index: {}]   ;;  %s1078_s1 = inlined_call_operand.hbm [shape: f32[16,64], index: 1, kind: input, shape index: {}]   ;;  %s1079_s2 = inlined_call_operand.vmem [shape: f32[1,64], index: 2, kind: input, shape index: {}]   ;;  %s1080_s3 = inlined_call_operand.vmem [shape: f32[64,64], index: 3, kind: input, shape index: {}]   ;;  %s1081_s4 = inlined_call_operand.vmem [shape: f32[1,64], index: 4, kind: input, shape index: {}]   ;;  %s1082_s5 = inlined_call_operand.vmem [shape: f32[64,128], index: 5, kind: input, shape index: {}]   ;;  %s1083_s6 = inlined_call_operand.vmem [shape: f32[1,128], index: 6, kind: input, shape index: {}]   ;;  %s1084_s7 = inlined_call_operand.vmem [shape: f32[16,128], index: 7, kind: input, shape index: {}]   ;;  %s1085_s8 = inlined_call_operand.vmem [shape: f32[128,8], index: 8, kind: input, shape index: {}]   ;;  %s1086_s9 = inlined_call_operand.hbm [shape: f32[8,8], index: 9, kind: output, shape index: {0}]   ;;  %s1087_s10 = inlined_call_operand.hbm [shape: f32[8,128], index: 10, kind: output, shape index: {1}]  }
   0x1   :  { %17 = vsyncpa [#allocation6], 0 }
   0x2   :  { %18 = vsyncpa [#allocation4], 0 }
   0x3   :  { %19 = vsyncpa [#allocation9], 0  ;;  %s811_s13 = smov [#allocation2]   ;;  %s812_s15 = smov [#allocation5]  }
   0x4   :  { %s26_s14 = sshll.u32 %s811_s13, 4  ;;  %s35_s16 = sshll.u32 %s812_s15, 4  ;;  %s27_s14 = int_to_ptr.vmem [resolvable:$true] %s26_s14  ;;  %s875_s16 = int_to_ptr.vmem [resolvable:$true] %s35_s16 }
   0x5   :  { %s715_s19 = scalar_lea.hbm %s1077_s0, 128 }
   0x6   :  { %p716_p0 = scmp.ne.s32.totalorder %s1077_s0, %s715_s19  ;;  %p719_p1 = scmp.lt.u32.totalorder %s715_s19, %s1077_s0 }
   0x8   :  { %p721_p2 = pnand %p719_p1, %p716_p0 }
   0xa   :  { %724 = shalt.err (!%p721_p2)
}
   0xb   :  { %s725_s24 = scalar_lea.vmem %s27_s14, 128  ;;  %p730_p4 = scmp.lt.s32.totalorder %s27_s14, %s27_s14 }
   0xc   :  { %p726_p3 = scmp.ne.s32.totalorder %s27_s14, %s725_s24  ;;  %p731_p5 = scmp.lt.s32.totalorder %s725_s24, %s725_s24 }
   0xe   :  { %p732_p6 = por %p731_p5, %p730_p4 }
  0x10   :  { %p733_p7 = pnand %p732_p6, %p726_p3 }
  0x12   :  { %736 = shalt.err (!%p733_p7)
}
  0x13   :  { %29 = dma.hbm_to_vmem [thread:$0]  %s1077_s0, 128, %s27_s14, [#allocation3]  }
  0x14   :  { %s737_s29 = scalar_lea.hbm %s1078_s1, 256 }
  0x15   :  { %p738_p8 = scmp.ne.s32.totalorder %s1078_s1, %s737_s29  ;;  %p741_p9 = scmp.lt.u32.totalorder %s737_s29, %s1078_s1 }
  0x17   :  { %p743_p10 = pnand %p741_p9, %p738_p8 }
  0x19   :  { %746 = shalt.err (!%p743_p10)
}
  0x1a   :  { %s747_s15 = scalar_lea.vmem %s875_s16, 256  ;;  %p752_p12 = scmp.lt.s32.totalorder %s875_s16, %s875_s16 }
  0x1b   :  { %p748_p11 = scmp.ne.s32.totalorder %s875_s16, %s747_s15  ;;  %p753_p13 = scmp.lt.s32.totalorder %s747_s15, %s747_s15 }
  0x1d   :  { %p754_p0 = por %p753_p13, %p752_p12 }
  0x1f   :  { %p755_p1 = pnand %p754_p0, %p748_p11 }
  0x21   :  { %758 = shalt.err (!%p755_p1)
}
  0x22   :  { %s813_s0 = smov 128   ;;  %s814_s14 = smov 8  }
  0x23   :  { %41 = dma.hbm_to_vmem [thread:$0]  %s1078_s1, 256, %s875_s16, [#allocation6], %s813_s0, %s813_s0, %s814_s14  }
  0x24   :  { %803 = dma.done.wait [#allocation3], 128  }
  0x25   :  { %804 = vsyncadd [#allocation3], 4294967168 }
  0x26   :  { %805 = dma.done.wait [#allocation6], 256  }
  0x27   :  { %806 = vsyncadd [#allocation6], 4294967040  ;;  %v815_v0 = vmov 0.0|0.0   ;;  %vm816_vm0 = vmmov 0   ;;  %v817_v1 = vmov 0.0   ;;  %v63_v2 = vld [vmem:[#allocation5] sm:$0xff] }
  0x28   :  { %652 = vmatprep.subr.bf16.mxu0 %v815_v0  ;;  %569 = vmatprep.mubr.msk.f32.mxu0 %vm816_vm0, %v817_v1  ;;  %v64_v3 = vld [vmem:[#allocation5 + $0x8] sm:$0xff]  ;;  %v147_v5 = vld [vmem:[%s1080_s3] sm:$0xff]  ;;  %v148_v6 = vld [vmem:[%s1080_s3 + $0x8] sm:$0xff]  ;;  %vm72_vm1 = vcmask 130048   ;;  %vm162_vm2 = vcmask 523264  }
  0x29   :  { %655 = vmatprep.subr.bf16.mxu1 %v815_v0  ;;  %588 = vmatprep.mubr.msk.f32.mxu1 %vm816_vm0, %v817_v1  ;;  %v653_v4 = vpack.c.bf16 %v64_v3, %v63_v2  ;;  %v149_v7 = vld [vmem:[%s1080_s3 + $0x10] sm:$0xff]  ;;  %v656_v8 = vpack.c.bf16 %v148_v6, %v147_v5  ;;  %v150_v9 = vld [vmem:[%s1080_s3 + $0x18] sm:$0xff]  ;;  %v924_v10 = vld [vmem:[#allocation2] sm:$0xff] }
  0x2a   :  { %v659_v11 = vpack.c.bf16 %v150_v9, %v149_v7  ;;  %v151_v12 = vld [vmem:[%s1080_s3 + $0x20] sm:$0xff]  ;;  %v152_v13 = vld [vmem:[%s1080_s3 + $0x28] sm:$0xff]  ;;  %v153_v15 = vld [vmem:[%s1080_s3 + $0x30] sm:$0xff] }
  0x2b   :  { %654 = vmatpush3.bf16.msra.mxu0 %v653_v4  ;;  %657 = vmatpush3.bf16.msra.mxu1 %v656_v8  ;;  %v662_v14 = vpack.c.bf16 %v152_v13, %v151_v12  ;;  %v154_v16 = vld [vmem:[%s1080_s3 + $0x38] sm:$0xff]  ;;  %v517_v18 = vld [vmem:[%s1079_s2] ss:$0 sm:$0xff]  ;;  %v238_v20 = vld [vmem:[%s1082_s5 + $0x8] sm:$0xff]  ;;  %s818_s3 = smov [#allocation8]  }
  0x2c   :  { %682 = vmatprep.subr.bf16.mxu0 %v815_v0  ;;  %658 = vmatprep.subr.bf16.mxu1 %v815_v0  ;;  %v665_v17 = vpack.c.bf16 %v154_v16, %v153_v15  ;;  %v237_v19 = vld [vmem:[%s1082_s5] sm:$0xff]  ;;  %v239_v26 = vld [vmem:[%s1082_s5 + $0x10] sm:$0xff]  ;;  %v240_v27 = vld [vmem:[%s1082_s5 + $0x18] sm:$0xff]  ;;  %s503_s1 = sshll.u32 %s818_s3, 4  ;;  %s504_s1 = int_to_ptr.vmem [resolvable:$true] %s503_s1 }
  0x2d   :  { %v668_v24 = vpack.c.bf16 %v238_v20, %v237_v19  ;;  %v671_v28 = vpack.c.bf16 %v240_v27, %v239_v26  ;;  %v241_v29 = vld [vmem:[%s1082_s5 + $0x20] sm:$0xff]  ;;  %v242_v30 = vld [vmem:[%s1082_s5 + $0x28] sm:$0xff]  ;;  %v243_v32 = vld [vmem:[%s1082_s5 + $0x30] sm:$0xff]  ;;  %s759_s16 = scalar_lea.vmem %s504_s1, 128  ;;  %p764_p3 = scmp.lt.s32.totalorder %s504_s1, %s504_s1 }
  0x2e   :  { %570 = vmatmul.mubr.msk.f32.vlgmr.msra.gmra.mrb[0].mxu0 %vm72_vm1, %v924_v10  ;;  %v674_v31 = vpack.c.bf16 %v242_v30, %v241_v29  ;;  %v244_v33 = vld [vmem:[%s1082_s5 + $0x38] sm:$0xff]  ;;  %v399_v35 = vld [vmem:[%s1085_s8] sm:$0xff]  ;;  %v400_v36 = vld [vmem:[%s1085_s8 + $0x8] sm:$0xff]  ;;  %p760_p2 = scmp.ne.s32.totalorder %s504_s1, %s759_s16  ;;  %p765_p4 = scmp.lt.s32.totalorder %s759_s16, %s759_s16 }
  0x2f   :  { %649 = vmatprep.mubr.msk.f32.mxu0 %vm816_vm0, %v817_v1  ;;  %660 = vmatpush3.bf16.msra.mxu1 %v659_v11  ;;  %v677_v34 = vpack.c.bf16 %v244_v33, %v243_v32  ;;  %v401_v37 = vld [vmem:[%s1085_s8 + $0x10] sm:$0xff]  ;;  %v683_v38 = vpack.c.bf16 %v400_v36, %v399_v35  ;;  %v402_v39 = vld [vmem:[%s1085_s8 + $0x18] sm:$0xff]  ;;  %v403_v41 = vld [vmem:[%s1085_s8 + $0x20] sm:$0xff] }
  0x30   :  { %661 = vmatprep.subr.bf16.mxu1 %v815_v0  ;;  %v686_v40 = vpack.c.bf16 %v402_v39, %v401_v37  ;;  %v404_v42 = vld [vmem:[%s1085_s8 + $0x28] sm:$0xff]  ;;  %v405_v44 = vld [vmem:[%s1085_s8 + $0x30] sm:$0xff]  ;;  %v406_v45 = vld [vmem:[%s1085_s8 + $0x38] sm:$0xff]  ;;  %p766_p5 = por %p765_p4, %p764_p3 }
  0x31   :  { %684 = vmatpush3.bf16.msra.mxu0 %v683_v38  ;;  %v689_v43 = vpack.c.bf16 %v404_v42, %v403_v41  ;;  %v692_v46 = vpack.c.bf16 %v406_v45, %v405_v44  ;;  %v407_v47 = vld [vmem:[%s1085_s8 + $0x40] sm:$0xff]  ;;  %v408_v48 = vld [vmem:[%s1085_s8 + $0x48] sm:$0xff]  ;;  %v409_v50 = vld [vmem:[%s1085_s8 + $0x50] sm:$0xff] }
  0x32   :  { %685 = vmatprep.subr.bf16.mxu0 %v815_v0  ;;  %v695_v49 = vpack.c.bf16 %v408_v48, %v407_v47  ;;  %v410_v51 = vld [vmem:[%s1085_s8 + $0x58] sm:$0xff]  ;;  %v519_v53 = vld [vmem:[%s1081_s4] ss:$0 sm:$0xff]  ;;  %v327_v55 = vld [vmem:[%s1084_s7 + $0x8] sm:$0xff]  ;;  %p767_p6 = pnand %p766_p5, %p760_p2 }
  0x33   :  { %663 = vmatpush3.bf16.msra.mxu1 %v662_v14  ;;  %v698_v52 = vpack.c.bf16 %v410_v51, %v409_v50  ;;  %v326_v54 = vld [vmem:[%s1084_s7] sm:$0xff]  ;;  %v412_v62 = vld [vmem:[%s1085_s8 + $0x68] sm:$0xff]  ;;  %v413_v2 = vld [vmem:[%s1085_s8 + $0x70] sm:$0xff] }
  0x34   :  { %664 = vmatprep.subr.bf16.mxu1 %v815_v0  ;;  %v680_v59 = vpack.c.bf16 %v327_v55, %v326_v54  ;;  %v411_v61 = vld [vmem:[%s1085_s8 + $0x60] sm:$0xff] }
  0x35   :  { %687 = vmatpush3.bf16.msra.mxu0 %v686_v40  ;;  %v701_v63 = vpack.c.bf16 %v412_v62, %v411_v61  ;;  %v521_v4 = vld [vmem:[%s1083_s6] ss:$0 sm:$0xff] }
  0x36   :  { %688 = vmatprep.subr.bf16.mxu0 %v815_v0 }
  0x37   :  { %666 = vmatpush3.bf16.msra.mxu1 %v665_v17 }
  0x38   :  { %667 = vmatprep.subr.bf16.mxu1 %v815_v0 }
  0x39   :  { %690 = vmatpush3.bf16.msra.mxu0 %v689_v43 }
  0x3a   :  { %691 = vmatprep.subr.bf16.mxu0 %v815_v0 }
  0x3d   :  { %693 = vmatpush3.bf16.msra.mxu0 %v692_v46 }
  0x3e   :  { %694 = vmatprep.subr.bf16.mxu0 %v815_v0 }
  0x41   :  { %696 = vmatpush3.bf16.msra.mxu0 %v695_v49 }
  0x42   :  { %697 = vmatprep.subr.bf16.mxu0 %v815_v0 }
  0x45   :  { %699 = vmatpush3.bf16.msra.mxu0 %v698_v52 }
  0x46   :  { %700 = vmatprep.subr.bf16.mxu0 %v815_v0 }
  0x49   :  { %702 = vmatpush3.bf16.msra.mxu0 %v701_v63 }
  0x4a   :  { %703 = vmatprep.subr.bf16.mxu0 %v815_v0 }
 0x101   :  { %v142_v21 = vpop.f32.mrb[0].mxu0 }
 0x102   :  { %v143_v22 = vadd.f32 %v517_v18, %v142_v21  ;;  %v571_v23 = vpop.f32.mrb[1].mxu0 }
 0x104   :  { %v146_v25 = vmax.f32 %v143_v22, 0.0 }
 0x106   :  { %589 = vmatmul.mubr.msk.f32.vlgmr.msra.gmra.mrb[0].mxu1 %vm162_vm2, %v146_v25 }
 0x107   :  { %669 = vmatpush3.bf16.msra.mxu1 %v668_v24  ;;  %607 = vmatprep.mubr.msk.f32.mxu1 %vm816_vm0, %v817_v1 }
 0x108   :  { %670 = vmatprep.subr.bf16.mxu1 %v815_v0 }
 0x10b   :  { %672 = vmatpush3.bf16.msra.mxu1 %v671_v28 }
 0x10c   :  { %673 = vmatprep.subr.bf16.mxu1 %v815_v0 }
 0x10f   :  { %675 = vmatpush3.bf16.msra.mxu1 %v674_v31 }
 0x110   :  { %676 = vmatprep.subr.bf16.mxu1 %v815_v0 }
 0x113   :  { %678 = vmatpush3.bf16.msra.mxu1 %v677_v34 }
 0x114   :  { %679 = vmatprep.subr.bf16.mxu1 %v815_v0 }
 0x1d9   :  { %v232_v56 = vpop.f32.mrb[0].mxu1 }
 0x1da   :  { %v233_v57 = vadd.f32 %v519_v53, %v232_v56  ;;  %v590_v58 = vpop.f32.mrb[1].mxu1 }
 0x1dc   :  { %v236_v60 = vmax.f32 %v233_v57, 0.0 }
 0x1de   :  { %608 = vmatmul.mubr.msk.f32.vlgmr.msra.gmra.mrb[2].mxu1 %vm162_vm2, %v236_v60 }
 0x1df   :  { %681 = vmatpush3.bf16.msra.mxu1 %v680_v59  ;;  %614 = vmatprep.mubr.msk.f32.mxu1 %vm816_vm0, %v817_v1  ;;  %v414_v1 = vld [vmem:[%s1085_s8 + $0x78] sm:$0xff] }
 0x1e0   :  { %v704_v3 = vpack.c.bf16 %v414_v1, %v413_v2 }
 0x1e2   :  { %615 = vmatmul.mubr.msk.f32.vlgmr.msra.gmra.mrb[4].mxu1 %vm72_vm1, %v924_v10  ;;  %705 = vmatpush3.bf16.msra.mxu0 %v704_v3 }
 0x2b1   :  { %v321_v5 = vpop.f32.mrb[2].mxu1 }
 0x2b2   :  { %v322_v6 = vadd.f32 %v521_v4, %v321_v5  ;;  %v609_v7 = vpop.f32.mrb[3].mxu1 }
 0x2b4   :  { %325 = vst [vmem:[#allocation8] sm:$0xff] %v322_v6 }
 0x2b5   :  { %v394_v8 = vpop.f32.mrb[4].mxu1 }
 0x2b6   :  { %v398_v0 = vmul.f32 %v394_v8, %v322_v6  ;;  %v616_v9 = vpop.f32.mrb[5].mxu1 }
 0x2b8   :  { %650 = vmatmul.mubr.f32.vlgmr.msra.gmra.mrb[2].mxu0 %v398_v0 }
 0x2b9   :  { %770 = shalt.err (!%p767_p6)
}
 0x2ba   :  { %s771_s2 = scalar_lea.hbm %s1087_s10, 128 }
 0x2bb   :  { %p772_p7 = scmp.ne.s32.totalorder %s1087_s10, %s771_s2  ;;  %p775_p8 = scmp.lt.u32.totalorder %s771_s2, %s1087_s10 }
 0x2bd   :  { %p777_p9 = pnand %p775_p8, %p772_p7 }
 0x2bf   :  { %780 = shalt.err (!%p777_p9)
}
 0x2c0   :  { %506 = dma.vmem_to_hbm [thread:$0]  %s504_s1, 128, %s1087_s10, [#allocation9]   ;;  %vm485_vm3 = vcmask 64512  }
 0x2c1   :  { %s819_s25 = smov [#allocation7]  }
 0x2c2   :  { %s493_s26 = sshll.u32 %s819_s25, 4  ;;  %s494_s26 = int_to_ptr.vmem [resolvable:$true] %s493_s26 }
 0x2c3   :  { %s781_s27 = scalar_lea.vmem %s494_s26, 128  ;;  %p786_p11 = scmp.lt.s32.totalorder %s494_s26, %s494_s26 }
 0x2c4   :  { %p782_p10 = scmp.ne.s32.totalorder %s494_s26, %s781_s27  ;;  %p787_p12 = scmp.lt.s32.totalorder %s781_s27, %s781_s27 }
 0x2c6   :  { %p788_p13 = por %p787_p12, %p786_p11 }
 0x2c8   :  { %p789_p0 = pnand %p788_p13, %p782_p10 }
 0x38b   :  { %v481_v10 = vpop.f32.mrb[2].mxu0 }
 0x38c   :  { %v651_v11 = vpop.f32.mrb[3].mxu0  ;;  %486 = vst.msk [vmem:[#allocation7] sm:$0xff] %vm485_vm3, %v481_v10 }
 0x38d   :  { %792 = shalt.err (!%p789_p0)
}
 0x38e   :  { %s793_s30 = scalar_lea.hbm %s1086_s9, 128 }
 0x38f   :  { %p794_p1 = scmp.ne.s32.totalorder %s1086_s9, %s793_s30  ;;  %p797_p2 = scmp.lt.u32.totalorder %s793_s30, %s1086_s9 }
 0x391   :  { %p799_p3 = pnand %p797_p2, %p794_p1 }
 0x393   :  { %802 = shalt.err (!%p799_p3)
}
 0x394   :  { %496 = dma.vmem_to_hbm [thread:$0]  %s494_s26, 128, %s1086_s9, [#allocation4]  }
 0x395   :  { %807 = dma.done.wait [#allocation4], 128  }
 0x396   :  { %808 = vsyncadd [#allocation4], 4294967168 }
 0x397   :  { %809 = dma.done.wait [#allocation9], 128  }
 0x398   :  { %810 = vsyncadd [#allocation9], 4294967168 }
 0x399   :  { %513 = vsyncpa [#allocation3], 1 }
 0x39a   :  { %514 = vsyncpa [#allocation6], 1 }
 0x39b   :  { %515 = vsyncpa [#allocation4], 1 }
 0x39c   :  { %516 = vsyncpa [#allocation9], 1 }

</bundles_post_ra>
